<compile_context>
chip_gen: v7x
topology: tpu7x:2x2x1
jax: 0.10.0
libtpu: 0.0.40
codegen_flags: <defaults>
</compile_context>

<pallas_src>
import functools

import jax
import jax.numpy as jnp
import numpy as np
from jax import lax
from jax.experimental import pallas as pl
from jax.experimental.pallas import tpu as pltpu


def _round_up(x, m):
    return (x + m - 1) // m * m


# ---------------------------------------------------------------------------
# Kernel helpers (traced inside the Pallas kernel bodies)
# ---------------------------------------------------------------------------
def _logits_and_denominator(anchor_ref, contrast_t_ref, temperature, n_valid,
                            block_a):
    """MXU matmul + masked, numerically-stable softmax denominator."""
    i = pl.program_id(0)

    # logits = (anchor @ contrast.T) / temperature.  Contrast is pre-transposed
    # to [Dp, Np] (lane-dense Np, no in-kernel transpose); bf16 operands with
    # f32 accumulation.  Temperature is static -> one scalar multiply.
    logits = jnp.dot(anchor_ref[...], contrast_t_ref[...],
                     preferred_element_type=jnp.float32)
    logits = logits * jnp.float32(1.0 / temperature)

    ta, npad = logits.shape
    # Masks built in-kernel: no O(A*N) mask traffic from HBM.
    row_g = lax.broadcasted_iota(jnp.int32, (ta, npad), 0) + i * block_a
    col = lax.broadcasted_iota(jnp.int32, (ta, npad), 1)
    col_valid = col < n_valid                 # padded contrast columns
    neg_mask = jnp.logical_and(col_valid, row_g != col)   # torch logits_mask

    # Row max over valid columns (the shift cancels exactly in log_prob).
    logits_max = jnp.max(jnp.where(col_valid, logits, -jnp.inf),
                         axis=1, keepdims=True)
    shifted = logits - logits_max

    # exp(-inf) == 0 fuses diagonal/padding removal into the exp (no extra
    # [TA, Np] multiply by a logits_mask tensor).
    exp_neg = jnp.exp(jnp.where(neg_mask, shifted, -jnp.inf))
    log_denom = jnp.log(jnp.sum(exp_neg, axis=1, keepdims=True))
    return shifted, neg_mask, log_denom


def _finalize(o_ref, pos_sum, pos_cnt, log_denom, temperature,
              base_temperature):
    # mean_log_prob_pos = sum(m * (shifted - log_denom)) / sum(m)
    #                   = pos_sum / pos_cnt - log_denom
    # NOTE: rows with no positive partner give inf/NaN, matching the original
    # torch code's divide-by-zero behavior.
    inv_cnt = pl.reciprocal(pos_cnt, approx=True)     # EUP slot, off the VALU
    mean_log_prob_pos = pos_sum * inv_cnt - log_denom
    scale = jnp.float32(-(temperature / base_temperature))
    o_ref[...] = scale * mean_log_prob_pos


def _supcon_kernel_labels(anchor_ref, contrast_t_ref, a_lbl_ref, c_lbl_ref,
                          o_ref, *, temperature, base_temperature, n_valid,
                          block_a):
    # anchor_ref:     [TA, Dp] bf16 anchor tile
    # contrast_t_ref: [Dp, Np] bf16 contrast (transposed), resident
    # a_lbl_ref:      [TA, 1]  int32 anchor labels (padded rows = -1)
    # c_lbl_ref:      [1, Np]  int32 contrast labels (padded cols = -2)
    # o_ref:          [TA, 1]  f32 per-anchor loss
    shifted, neg_mask, log_denom = _logits_and_denominator(
        anchor_ref, contrast_t_ref, temperature, n_valid, block_a)
    pos_mask = jnp.logical_and(a_lbl_ref[...] == c_lbl_ref[...], neg_mask)
    pos_cnt = jnp.sum(pos_mask.astype(jnp.float32), axis=1, keepdims=True)
    pos_sum = jnp.sum(jnp.where(pos_mask, shifted, 0.0), axis=1, keepdims=True)
    _finalize(o_ref, pos_sum, pos_cnt, log_denom, temperature,
              base_temperature)


def _supcon_kernel_dense(anchor_ref, contrast_t_ref, mask_ref, o_ref, *,
                         temperature, base_temperature, n_valid, block_a):
    # Fallback path for an explicit (possibly asymmetric / weighted) mask.
    shifted, neg_mask, log_denom = _logits_and_denominator(
        anchor_ref, contrast_t_ref, temperature, n_valid, block_a)
    m = mask_ref[...].astype(jnp.float32) * neg_mask.astype(jnp.float32)
    pos_cnt = jnp.sum(m, axis=1, keepdims=True)
    pos_sum = jnp.sum(m * shifted, axis=1, keepdims=True)
    _finalize(o_ref, pos_sum, pos_cnt, log_denom, temperature,
              base_temperature)


# ---------------------------------------------------------------------------
# Wrapper (mask construction, padding, tiling)
# ---------------------------------------------------------------------------
def supcon_loss(features, labels=None, mask=None, *, temperature=0.07,
                contrast_mode='all', base_temperature=0.07, block_a=256):
    """Pallas implementation of SupConLoss.forward."""
    if features.ndim < 3:
        raise ValueError('`features` needs to be [bsz, n_views, ...]')
    bsz, n_views = features.shape[0], features.shape[1]
    feats = features.reshape(bsz, n_views, -1)
    d0 = feats.shape[-1]

    if labels is not None and mask is not None:
        raise ValueError('Cannot define both `labels` and `mask`')

    contrast_count = n_views
    # torch.cat(torch.unbind(features, 1), 0): row v*bsz + i == feats[i, v]
    contrast = jnp.transpose(feats, (1, 0, 2)).reshape(n_views * bsz, d0)
    if contrast_mode == 'one':
        anchor = feats[:, 0]
        anchor_count = 1
    elif contrast_mode == 'all':
        anchor = contrast
        anchor_count = contrast_count
    else:
        raise ValueError('Unknown mode: {}'.format(contrast_mode))

    n = contrast.shape[0]
    a = anchor.shape[0]

    # ---- padded / transposed bf16 layouts for the MXU ----------------------
    dp = _round_up(d0, 128)
    n_pad = _round_up(n, 128)
    blk = min(block_a, _round_up(a, 8))
    a_pad = _round_up(a, blk)
    num_tiles = a_pad // blk

    anchor_p = jnp.zeros((a_pad, dp), jnp.bfloat16).at[:a, :d0].set(
        anchor.astype(jnp.bfloat16))
    contrast_t = jnp.zeros((dp, n_pad), jnp.bfloat16).at[:d0, :n].set(
        contrast.astype(jnp.bfloat16).T)

    in_specs = [
        pl.BlockSpec((blk, dp), lambda i: (i, 0)),       # anchor tile
        pl.BlockSpec((dp, n_pad), lambda i: (0, 0)),     # contrast, resident
    ]

    common = dict(temperature=float(temperature),
                  base_temperature=float(base_temperature),
                  n_valid=n, block_a=blk)

    if mask is not None:
        # Explicit-mask path: dense tiled mask (kept for API parity).
        base_mask = jnp.asarray(mask, dtype=jnp.float32)
        mask_full = jnp.tile(base_mask, (anchor_count, contrast_count))
        mask_p = jnp.zeros((a_pad, n_pad), jnp.float32).at[:a, :n].set(mask_full)
        in_specs.append(pl.BlockSpec((blk, n_pad), lambda i: (i, 0)))
        operands = (anchor_p, contrast_t, mask_p)
        kernel = functools.partial(_supcon_kernel_dense, **common)
    else:
        if labels is None:
            base_labels = jnp.arange(bsz, dtype=jnp.int32)   # eye == SimCLR
        else:
            base_labels = jnp.asarray(labels, dtype=jnp.int32).reshape(-1)
            if base_labels.shape[0] != bsz:
                raise ValueError('Num of labels does not match num of features')
        c_lbl = jnp.tile(base_labels, (n_views,))             # [N]
        a_lbl = c_lbl[:a]                                     # [A] (both modes)
        # Sentinel labels on the padding so padded rows/cols never match.
        a_lbl_p = jnp.full((a_pad, 1), -1, jnp.int32).at[:a, 0].set(a_lbl)
        c_lbl_p = jnp.full((1, n_pad), -2, jnp.int32).at[0, :n].set(c_lbl)
        in_specs.append(pl.BlockSpec((blk, 1), lambda i: (i, 0)))
        in_specs.append(pl.BlockSpec((1, n_pad), lambda i: (0, 0)))
        operands = (anchor_p, contrast_t, a_lbl_p, c_lbl_p)
        kernel = functools.partial(_supcon_kernel_labels, **common)

    out_spec = pl.BlockSpec((blk, 1), lambda i: (i, 0))

    # Explicit VMEM budget: resident contrast + double-buffered anchor tiles
    # + f32 epilogue intermediates, with headroom; capped for v7x (64 MiB).
    est = (2 * dp * n_pad * 2          # contrast bf16 (+ pipeline buffer)
           + 2 * blk * dp * 2          # anchor tiles bf16, double-buffered
           + 6 * blk * n_pad * 4       # f32 logits / masks / exp intermediates
           + 4 * (blk + n_pad) * 4)    # labels, per-row vectors, output
    vmem_limit = int(min(64 * 1024 * 1024, max(32 * 1024 * 1024, 2 * est)))

    per_row = pl.pallas_call(
        kernel,
        out_shape=jax.ShapeDtypeStruct((a_pad, 1), jnp.float32),
        grid=(num_tiles,),
        in_specs=in_specs,
        out_specs=out_spec,
        compiler_params=pltpu.CompilerParams(
            dimension_semantics=("parallel",),
            vmem_limit_bytes=vmem_limit),
    )(*operands)

    # loss.view(anchor_count, batch_size).mean() == mean over all A anchors;
    # padded anchor rows are sliced off here.
    return jnp.mean(per_row[:a, 0])


# ---------------------------------------------------------------------------
# Pure-JAX reference (mirrors the torch forward, contrast_mode='all')
# ---------------------------------------------------------------------------
def _supcon_loss_ref(features, labels=None, *,
                     temperature=0.07, base_temperature=0.07):
    bsz, n_views = features.shape[0], features.shape[1]
    feats = features.reshape(bsz, n_views, -1).astype(jnp.float32)
    if labels is None:
        base_mask = jnp.eye(bsz, dtype=jnp.float32)
    else:
        labels = jnp.asarray(labels).reshape(-1, 1)
        base_mask = (labels == labels.T).astype(jnp.float32)
    contrast = jnp.transpose(feats, (1, 0, 2)).reshape(n_views * bsz, -1)
    anchor = contrast
    logits = anchor @ contrast.T / temperature
    logits = logits - jnp.max(logits, axis=1, keepdims=True)
    N = n_views * bsz
    logits_mask = 1.0 - jnp.eye(N, dtype=jnp.float32)
    mask = jnp.tile(base_mask, (n_views, n_views)) * logits_mask
    exp_logits = jnp.exp(logits) * logits_mask
    log_prob = logits - jnp.log(exp_logits.sum(1, keepdims=True))
    mean_log_prob_pos = (mask * log_prob).sum(1) / mask.sum(1)
    loss = -(temperature / base_temperature) * mean_log_prob_pos
    return loss.mean()


if __name__ == "__main__":
    key = jax.random.PRNGKey(0)
    bsz, n_views, dim = 8, 2, 32
    kf, _ = jax.random.split(key)
    features = jax.random.normal(kf, (bsz, n_views, dim), dtype=jnp.float32)
    # L2-normalize per feature vector (typical SupCon usage)
    features = features / jnp.linalg.norm(features, axis=-1, keepdims=True)
    labels = jnp.array([0, 1, 2, 3, 0, 1, 2, 3], dtype=jnp.int32)

    loss = supcon_loss(features, labels=labels, temperature=0.07,
                       contrast_mode='all', base_temperature=0.07)
    loss = jax.block_until_ready(loss)

    # Reference on the same bf16-rounded features (the kernel feeds the MXU in
    # bf16 with f32 accumulation); tolerance covers bf16 rounding + the
    # approx-reciprocal of the positive count.
    feats_bf16 = features.astype(jnp.bfloat16).astype(jnp.float32)
    ref = _supcon_loss_ref(feats_bf16, labels=labels, temperature=0.07,
                           base_temperature=0.07)
    assert np.allclose(np.asarray(loss), np.asarray(ref),
                       rtol=5e-3, atol=5e-3), (float(loss), float(ref))

    print("KERNEL_OK")
</pallas_src>

<mosaic_0001>
module attributes {stable_mosaic.version = 11 : i64} {
  func.func @_supcon_kernel_labels(%arg0: i32, %arg1: memref<16x128xbf16, #tpu.memory_space<vmem>>, %arg2: memref<128x128xbf16, #tpu.memory_space<vmem>>, %arg3: memref<16x1xi32, #tpu.memory_space<vmem>>, %arg4: memref<1x128xi32, #tpu.memory_space<vmem>>, %arg5: memref<16x1xf32, #tpu.memory_space<vmem>>) attributes {dimension_semantics = [#tpu.dimension_semantics<parallel>], iteration_bounds = array<i64: 1>, scalar_prefetch = 0 : i64, scratch_operands = 0 : i64, tpu.core_type = #tpu.core_type<tc>, window_params = [{transform_indices = @transform_0, window_bounds = array<i64: 16, 128>}, {pipeline_mode = #tpu.pipeline_mode<synchronous>, transform_indices = @transform_1, window_bounds = array<i64: 128, 128>}, {transform_indices = @transform_2, window_bounds = array<i64: 16, 1>}, {pipeline_mode = #tpu.pipeline_mode<synchronous>, transform_indices = @transform_3, window_bounds = array<i64: 1, 128>}, {transform_indices = @transform_4, window_bounds = array<i64: 16, 1>}]} {
    %c0 = arith.constant 0 : index
    %c0_0 = arith.constant 0 : index
    %0 = vector.load %arg1[%c0, %c0_0] : memref<16x128xbf16, #tpu.memory_space<vmem>>, vector<16x128xbf16>
    %c0_1 = arith.constant 0 : index
    %c0_2 = arith.constant 0 : index
    %1 = vector.load %arg2[%c0_1, %c0_2] : memref<128x128xbf16, #tpu.memory_space<vmem>>, vector<128x128xbf16>
    %cst = arith.constant dense<0.000000e+00> : vector<16x128xf32>
    %2 = tpu.matmul %0, %1, %cst {dimension_numbers = #tpu.dot_dimension_numbers<[1], [0], [0], [1], [0, 0, 1, 1], [], []>} : vector<16x128xbf16>, vector<128x128xbf16>, vector<16x128xf32> -> vector<16x128xf32>
    %cst_3 = arith.constant 14.2857141 : f32
    %3 = vector.broadcast %cst_3 : f32 to vector<16x128xf32>
    %4 = arith.mulf %2, %3 : vector<16x128xf32>
    %5 = tpu.iota {dimensions = array<i32: 0>} : vector<16x128xi32>
    %c16_i32 = arith.constant 16 : i32
    %6 = arith.muli %arg0, %c16_i32 : i32
    %7 = vector.broadcast %6 : i32 to vector<16x128xi32>
    %8 = arith.addi %5, %7 : vector<16x128xi32>
    %9 = tpu.iota {dimensions = array<i32: 1>} : vector<16x128xi32>
    %c16_i32_4 = arith.constant 16 : i32
    %10 = vector.broadcast %c16_i32_4 : i32 to vector<16x128xi32>
    %11 = arith.cmpi slt, %9, %10 : vector<16x128xi32>
    %12 = arith.cmpi ne, %8, %9 : vector<16x128xi32>
    %13 = arith.andi %11, %12 : vector<16x128xi1>
    %cst_5 = arith.constant 0xFF800000 : f32
    %14 = vector.broadcast %cst_5 : f32 to vector<16x128xf32>
    %15 = arith.select %11, %4, %14 : vector<16x128xi1>, vector<16x128xf32>
    %cst_6 = arith.constant dense<0xFF800000> : vector<16xf32>
    %16 = vector.multi_reduction <maximumf>, %15, %cst_6 [1] : vector<16x128xf32> to vector<16xf32>
    %17 = vector.shape_cast %16 : vector<16xf32> to vector<16x1xf32>
    %18 = vector.broadcast %17 : vector<16x1xf32> to vector<16x128xf32>
    %19 = arith.subf %4, %18 : vector<16x128xf32>
    %cst_7 = arith.constant 0xFF800000 : f32
    %20 = vector.broadcast %cst_7 : f32 to vector<16x128xf32>
    %21 = arith.select %13, %19, %20 : vector<16x128xi1>, vector<16x128xf32>
    %22 = math.exp %21 : vector<16x128xf32>
    %cst_8 = arith.constant dense<0.000000e+00> : vector<16xf32>
    %23 = vector.multi_reduction <add>, %22, %cst_8 [1] : vector<16x128xf32> to vector<16xf32>
    %24 = vector.shape_cast %23 : vector<16xf32> to vector<16x1xf32>
    %25 = math.log %24 : vector<16x1xf32>
    %c0_9 = arith.constant 0 : index
    %c0_10 = arith.constant 0 : index
    %26 = vector.load %arg3[%c0_9, %c0_10] : memref<16x1xi32, #tpu.memory_space<vmem>>, vector<16x1xi32>
    %c0_11 = arith.constant 0 : index
    %c0_12 = arith.constant 0 : index
    %27 = vector.load %arg4[%c0_11, %c0_12] : memref<1x128xi32, #tpu.memory_space<vmem>>, vector<1x128xi32>
    %28 = vector.broadcast %26 : vector<16x1xi32> to vector<16x128xi32>
    %29 = vector.broadcast %27 : vector<1x128xi32> to vector<16x128xi32>
    %30 = arith.cmpi eq, %28, %29 : vector<16x128xi32>
    %31 = arith.andi %30, %13 : vector<16x128xi1>
    %32 = arith.extui %31 : vector<16x128xi1> to vector<16x128xi32>
    %33 = arith.sitofp %32 : vector<16x128xi32> to vector<16x128xf32>
    %cst_13 = arith.constant dense<0.000000e+00> : vector<16xf32>
    %34 = vector.multi_reduction <add>, %33, %cst_13 [1] : vector<16x128xf32> to vector<16xf32>
    %35 = vector.shape_cast %34 : vector<16xf32> to vector<16x1xf32>
    %cst_14 = arith.constant 0.000000e+00 : f32
    %36 = vector.broadcast %cst_14 : f32 to vector<16x128xf32>
    %37 = arith.select %31, %19, %36 : vector<16x128xi1>, vector<16x128xf32>
    %cst_15 = arith.constant dense<0.000000e+00> : vector<16xf32>
    %38 = vector.multi_reduction <add>, %37, %cst_15 [1] : vector<16x128xf32> to vector<16xf32>
    %39 = vector.shape_cast %38 : vector<16xf32> to vector<16x1xf32>
    %40 = tpu.reciprocal %35 {approx = true} : vector<16x1xf32> -> vector<16x1xf32>
    %41 = arith.mulf %39, %40 : vector<16x1xf32>
    %42 = arith.subf %41, %25 : vector<16x1xf32>
    %cst_16 = arith.constant -1.000000e+00 : f32
    %43 = vector.broadcast %cst_16 : f32 to vector<16x1xf32>
    %44 = arith.mulf %43, %42 : vector<16x1xf32>
    %c0_17 = arith.constant 0 : index
    %c0_18 = arith.constant 0 : index
    %45 = vector.load %arg5[%c0_17, %c0_18] : memref<16x1xf32, #tpu.memory_space<vmem>>, vector<16x1xf32>
    tpu.vector_store %arg5[%c0_17, %c0_18], %44 {strides = array<i32>} : memref<16x1xf32, #tpu.memory_space<vmem>>, vector<16x1xf32>,
    return
  }
  func.func @transform_0(%arg0: i32) -> (i32, i32) {
    %c0_i32 = arith.constant 0 : i32
    %c0_i32_0 = arith.constant 0 : i32
    return %arg0, %c0_i32 : i32, i32
  }
  func.func @transform_1(%arg0: i32) -> (i32, i32) {
    %c0_i32 = arith.constant 0 : i32
    %c0_i32_0 = arith.constant 0 : i32
    %c0_i32_1 = arith.constant 0 : i32
    return %c0_i32, %c0_i32_0 : i32, i32
  }
  func.func @transform_2(%arg0: i32) -> (i32, i32) {
    %c0_i32 = arith.constant 0 : i32
    %c0_i32_0 = arith.constant 0 : i32
    return %arg0, %c0_i32 : i32, i32
  }
  func.func @transform_3(%arg0: i32) -> (i32, i32) {
    %c0_i32 = arith.constant 0 : i32
    %c0_i32_0 = arith.constant 0 : i32
    %c0_i32_1 = arith.constant 0 : i32
    return %c0_i32, %c0_i32_0 : i32, i32
  }
  func.func @transform_4(%arg0: i32) -> (i32, i32) {
    %c0_i32 = arith.constant 0 : i32
    %c0_i32_0 = arith.constant 0 : i32
    return %arg0, %c0_i32 : i32, i32
  }
}

</mosaic_0001>

<bundles_post_ra>
// kernel: tpu_custom_call.1
= control target key start
LH: loop header
LB: loop body
LE: loop exit
PB: predicated region body
PF: predicated region fallthrough
CT: control target
= control target key end

     0   :  { %9 = vsyncpa [#allocation3], 0  ;;  %s324_s15 = smov [#allocation2]   ;;  %s416_s0 = inlined_call_operand.vmem [shape: bf16[16,128], index: 0, kind: input, shape index: {}]   ;;  %s417_s1 = inlined_call_operand.hbm [shape: bf16[128,128], index: 1, kind: input, shape index: {}]   ;;  %s418_s2 = inlined_call_operand.vmem [shape: s32[16,1], index: 2, kind: input, shape index: {}]   ;;  %s419_s3 = inlined_call_operand.vmem [shape: s32[1,128], index: 3, kind: input, shape index: {}]   ;;  %s420_s4 = inlined_call_operand.vmem [shape: f32[16,1], index: 4, kind: output, shape index: {}]  }
   0x1   :  { %s17_s16 = sshll.u32 %s324_s15, 4  ;;  %s300_s19 = scalar_lea.hbm %s417_s1, 1024  ;;  %s18_s16 = int_to_ptr.vmem [resolvable:$true] %s17_s16 }
   0x2   :  { %p301_p0 = scmp.ne.s32.totalorder %s417_s1, %s300_s19  ;;  %p304_p1 = scmp.lt.u32.totalorder %s300_s19, %s417_s1 }
   0x4   :  { %p306_p2 = pnand %p304_p1, %p301_p0 }
   0x6   :  { %309 = shalt.err (!%p306_p2)
}
   0x7   :  { %s310_s24 = scalar_lea.vmem %s18_s16, 1024  ;;  %p315_p4 = scmp.lt.s32.totalorder %s18_s16, %s18_s16 }
   0x8   :  { %p311_p3 = scmp.ne.s32.totalorder %s18_s16, %s310_s24  ;;  %p316_p5 = scmp.lt.s32.totalorder %s310_s24, %s310_s24 }
   0xa   :  { %p317_p6 = por %p316_p5, %p315_p4 }
   0xc   :  { %p318_p7 = pnand %p317_p6, %p311_p3 }
   0xe   :  { %321 = shalt.err (!%p318_p7)
}
   0xf   :  { %s325_s25 = smov 64   ;;  %s326_s26 = smov 4  }
  0x10   :  { %23 = dma.hbm_to_vmem [thread:$0]  %s417_s1, 1024, %s18_s16, [#allocation3], %s325_s25, %s325_s25, %s326_s26  }
  0x11   :  { %322 = dma.done.wait [#allocation3], 1024  }
  0x12   :  { %323 = vsyncadd [#allocation3], 4294966272  ;;  %v327_v0 = vmov 0.0   ;;  %vm328_vm0 = vmmov 0   ;;  %v279_v1 = vld [vmem:[#allocation2] sm:$0xff]   ;;  %v280_v2 = vld [vmem:[#allocation2 + $0x8] sm:$0xff]   ;;  %v147_v13 = vlaneseq }
  0x13   :  { %251 = vmatprep.subr.bf16.mxu0 %v327_v0  ;;  %267 = vmatprep.mubr.msk.bf16.mxu0 %vm328_vm0, %v327_v0  ;;  %v281_v3 = vld [vmem:[#allocation2 + $0x10] sm:$0xff]   ;;  %v282_v4 = vld [vmem:[#allocation2 + $0x18] sm:$0xff]   ;;  %v283_v5 = vld [vmem:[#allocation2 + $0x20] sm:$0xff]   ;;  %v329_v11 = vmov 0   ;;  %vm222_vm10 = vcmask 7168  }
  0x14   :  { %252 = vmatpush3.bf16.msra.mxu0 %v279_v1  ;;  %v284_v6 = vld [vmem:[#allocation2 + $0x28] sm:$0xff]   ;;  %v285_v7 = vld [vmem:[#allocation2 + $0x30] sm:$0xff]   ;;  %v286_v8 = vld [vmem:[#allocation2 + $0x38] sm:$0xff]   ;;  %277 = vset.pattern.permute.xlu1 %v329_v11  ;;  %v155_v14 = vand.u32 127, %v147_v13  ;;  %v148_v23 = vshrl.u32 %v147_v13, 7 }
  0x15   :  { %253 = vmatprep.subr.bf16.mxu0 %v327_v0  ;;  %v287_v9 = vld [vmem:[%s416_s0] sm:$0xff]   ;;  %278 = vset.pattern.permute.xlu0 %v329_v11  ;;  %v184_v12 = vld [vmem:[%s418_s2 + $0x8] sm:$0xff] }
  0x16   :  { %v183_v10 = vld [vmem:[%s418_s2] sm:$0xff]  ;;  %vm156_vm1 = vcmp.lt.s32.totalorder %v155_v14, 16  ;;  %vm157_vm2 = vcmp.ne.s32.totalorder %v148_v23, %v155_v14  ;;  %v149_v24 = vadd.s32 8, %v148_v23 }
  0x17   :  { %187 = vperm.xlu1 %277, %v183_v10   ;;  %vm388_vm3 = vmand %vm156_vm1, %vm157_vm2  ;;  %v239_v35 = vld [vmem:[%s419_s3] ss:$0 sm:$0xff] }
  0x18   :  { %254 = vmatpush3.bf16.msra.mxu0 %v280_v2  ;;  %vm158_vm4 = vcmp.ne.s32.totalorder %v149_v24, %v155_v14 }
  0x19   :  { %255 = vmatprep.subr.bf16.mxu0 %v327_v0  ;;  %vm395_vm5 = vmand %vm156_vm1, %vm158_vm4 }
  0x1b   :  { %190 = vperm.xlu1 %277, %v184_v12  }
  0x1c   :  { %256 = vmatpush3.bf16.msra.mxu0 %v281_v3 }
  0x1d   :  { %257 = vmatprep.subr.bf16.mxu0 %v327_v0 }
  0x20   :  { %258 = vmatpush3.bf16.msra.mxu0 %v282_v4 }
  0x21   :  { %259 = vmatprep.subr.bf16.mxu0 %v327_v0 }
  0x24   :  { %260 = vmatpush3.bf16.msra.mxu0 %v283_v5 }
  0x25   :  { %261 = vmatprep.subr.bf16.mxu0 %v327_v0 }
  0x28   :  { %262 = vmatpush3.bf16.msra.mxu0 %v284_v6 }
  0x29   :  { %263 = vmatprep.subr.bf16.mxu0 %v327_v0 }
  0x2c   :  { %264 = vmatpush3.bf16.msra.mxu0 %v285_v7 }
  0x2d   :  { %265 = vmatprep.subr.bf16.mxu0 %v327_v0 }
  0x30   :  { %266 = vmatpush3.bf16.msra.mxu0 %v286_v8 }
  0x33   :  { %268 = vmatmul.mubr.bf16.vlgmr.msra.gmra.mrb[0].mxu0 %v287_v9 }
  0x96   :  { %v188_v36 = vpop.permute.xlu1 %187 }
  0x97   :  { %vm196_vm6 = vcmp.eq.s32.totalorder %v188_v36, %v239_v35 }
  0x98   :  { %vm198_vm7 = vmand %vm196_vm6, %vm388_vm3 }
  0x99   :  { %v240_v39 = vsel %vm198_vm7, 1.0, %v327_v0 }
  0x9a   :  { %v191_v38 = vpop.permute.xlu1 %190 }
  0x9b   :  { %vm197_vm8 = vcmp.eq.s32.totalorder %v191_v38, %v239_v35 }
  0x9c   :  { %vm199_vm9 = vmand %vm197_vm8, %vm395_vm5 }
  0x9d   :  { %v241_v41 = vsel %vm199_vm9, 1.0, %v327_v0 }
 0x106   :  { %v138_v15 = vpop.f32.mrb[0].mxu0 }
 0x107   :  { %v145_v16 = vmul.f32 14.285714, %v138_v15  ;;  %v269_v17 = vpop.f32.mrb[1].mxu0 }
 0x108   :  { %v141_v18 = vpop.f32.mrb[2].mxu0 }
 0x109   :  { %v146_v19 = vmul.f32 14.285714, %v141_v18  ;;  %v270_v20 = vpop.f32.mrb[3].mxu0  ;;  %v161_v21 = vsel %vm156_vm1, %v145_v16, -inf }
 0x10a   :  { %163 = vmax.xlane.f32.xlu0 %v161_v21 }
 0x10b   :  { %v162_v22 = vsel %vm156_vm1, %v146_v19, -inf }
 0x10e   :  { %165 = vmax.xlane.f32.xlu0 %v162_v22 }
 0x197   :  { %v164_v26 = vpop.xlane.xlu0 %163 }
 0x198   :  { %v167_v27 = vsub.f32 %v145_v16, %v164_v26 }
 0x19a   :  { %v169_v28 = vsel %vm388_vm3, %v167_v27, -inf  ;;  %v208_v42 = vsel %vm198_vm7, %v167_v27, 0.0 }
 0x19b   :  { %v171_v29 = vmul.f32 1.442695, %v169_v28  ;;  %v166_v31 = vpop.xlane.xlu0 %165 }
 0x19c   :  { %v168_v32 = vsub.f32 %v146_v19, %v166_v31 }
 0x19d   :  { %288 = vpow2.f32 %v171_v29 }
 0x19e   :  { %v170_v33 = vsel %vm395_vm5, %v168_v32, -inf  ;;  %v209_v43 = vsel %vm199_vm9, %v168_v32, 0.0 }
 0x19f   :  { %v173_v34 = vmul.f32 1.442695, %v170_v33 }
 0x1a1   :  { %290 = vpow2.f32 %v173_v34 }
 0x1a7   :  { %v289_v37 = vpop.eup %288 }
 0x1a8   :  { %175 = vadd.xlane.f32.xlu0 %v289_v37 }
 0x1ab   :  { %v291_v40 = vpop.eup %290 }
 0x1ac   :  { %204 = vadd.xlane.f32.xlu0 %v240_v39  ;;  %177 = vadd.xlane.f32.xlu1 %v291_v40 }
 0x1b0   :  { %206 = vadd.xlane.f32.xlu0 %v241_v41 }
 0x1b4   :  { %210 = vadd.xlane.f32.xlu0 %v208_v42 }
 0x1b8   :  { %212 = vadd.xlane.f32.xlu0 %v209_v43 }
 0x235   :  { %v176_v44 = vpop.xlane.xlu0 %175 }
 0x236   :  { %292 = vlog2.f32 %v176_v44 }
 0x239   :  { %v178_v45 = vpop.xlane.xlu1 %177  ;;  %v205_v46 = vpop.xlane.xlu0 %204 }
 0x23a   :  { %294 = vrcp.f32 %v205_v46 }
 0x23b   :  { %296 = vlog2.f32 %v178_v45 }
 0x23d   :  { %v207_v47 = vpop.xlane.xlu0 %206 }
 0x23e   :  { %298 = vrcp.f32 %v207_v47 }
 0x240   :  { %v293_v49 = vpop.eup %292 }
 0x241   :  { %v211_v48 = vpop.xlane.xlu0 %210  ;;  %v180_v52 = vmul.f32 0.6931472, %v293_v49 }
 0x244   :  { %v295_v50 = vpop.eup %294 }
 0x245   :  { %v297_v51 = vpop.eup %296  ;;  %v216_v53 = vmul.f32 %v295_v50, %v211_v48  ;;  %v213_v56 = vpop.xlane.xlu0 %212 }
 0x246   :  { %v182_v57 = vmul.f32 0.6931472, %v297_v51 }
 0x247   :  { %v218_v55 = vsub.f32 %v216_v53, %v180_v52 }
 0x248   :  { %v299_v54 = vpop.eup %298 }
 0x249   :  { %v217_v58 = vmul.f32 %v299_v54, %v213_v56  ;;  %v220_v59 = vmul.f32 -1.0, %v218_v55 }
 0x24b   :  { %v219_v60 = vsub.f32 %v217_v58, %v182_v57  ;;  %223 = vst.msk [vmem:[%s420_s4] sm:$0xff] %vm222_vm10, %v220_v59 }
 0x24d   :  { %v221_v61 = vmul.f32 -1.0, %v219_v60 }
 0x24f   :  { %224 = vst.msk [vmem:[%s420_s4 + $0x8] sm:$0xff] %vm222_vm10, %v221_v61 }
 0x250   :  { %229 = vsyncpa [#allocation3], 1 }

</bundles_post_ra>
